<compile_context>
chip_gen: v7x
topology: tpu7x:2x2x1
jax: 0.10.0
libtpu: 0.0.40
codegen_flags: <defaults>
</compile_context>

<pallas_src>
import jax
import jax.numpy as jnp
from jax.experimental import pallas as pl
from jax.experimental.pallas import tpu as pltpu


def _round_up(n, m):
    return ((n + m - 1) // m) * m


def _make_mlp_kernel(n_sub, sub_rows):
    """Build the kernel with a compile-time number of M-sub-tiles."""

    def kernel(x_ref, w1_ref, b1_ref, w2_ref, b2_ref, w3_ref, b3_ref, o_ref):
        # Weights/biases resident in VMEM across all grid steps (constant index map).
        w1 = w1_ref[...]
        w2 = w2_ref[...]
        w3 = w3_ref[...]
        b1 = b1_ref[...]
        b2 = b2_ref[...]
        b3 = b3_ref[...]
        # Static unroll over independent M-sub-tiles: keeps MXU pushes flowing
        # while earlier sub-tiles' results drain (hides MRF pop latency on v6e).
        for s in range(n_sub):
            r0 = s * sub_rows  # static offset -> free view
            x = x_ref[pl.ds(r0, sub_rows), :].astype(jnp.bfloat16)
            h1 = jnp.dot(x, w1, preferred_element_type=jnp.float32) + b1
            h1 = jnp.maximum(h1, 0.0).astype(jnp.bfloat16)
            h2 = jnp.dot(h1, w2, preferred_element_type=jnp.float32) + b2
            h2 = jnp.maximum(h2, 0.0).astype(jnp.bfloat16)
            out = jnp.dot(h2, w3, preferred_element_type=jnp.float32) + b3
            o_ref[pl.ds(r0, sub_rows), :] = out.astype(o_ref.dtype)

    return kernel


def _choose_batch_tile(B):
    """Batch tile: multiple of 8 sublanes, capped at 512, and (for large B)
    small enough that the grid has >= 2 steps so both v7x TensorCores get work."""
    if B <= 16:
        return _round_up(B, 8)
    tb = _round_up(pl.cdiv(B, 2), 8)  # at least 2 grid steps
    return min(512, tb)


def bank_generator_forward(x, padded_params, target_dim):
    """x: (B, latent_dim) f32. padded_params: lane-padded bf16 weights / f32 biases."""
    w1, b1 = padded_params["w1"], padded_params["b1"]
    w2, b2 = padded_params["w2"], padded_params["b2"]
    w3, b3 = padded_params["w3"], padded_params["b3"]

    B, K = x.shape
    H1 = w1.shape[1]
    H2 = w2.shape[1]
    NP = w3.shape[1]  # padded output width (multiple of 128)

    TB = _choose_batch_tile(B)
    grid = (pl.cdiv(B, TB),)

    # Split big tiles into 2 independent sub-tiles (each a multiple of 8 rows).
    n_sub = 2 if (TB >= 256 and TB % 16 == 0) else 1
    sub_rows = TB // n_sub

    tile_map = lambda i: (i, 0)   # x / out tiles march over the batch
    const_map = lambda i: (0, 0)  # weights & biases resident across all grid steps

    out = pl.pallas_call(
        _make_mlp_kernel(n_sub, sub_rows),
        out_shape=jax.ShapeDtypeStruct((B, NP), jnp.bfloat16),
        grid=grid,
        in_specs=[
            pl.BlockSpec((TB, K), tile_map),
            pl.BlockSpec((K, H1), const_map),
            pl.BlockSpec((1, H1), const_map),
            pl.BlockSpec((H1, H2), const_map),
            pl.BlockSpec((1, H2), const_map),
            pl.BlockSpec((H2, NP), const_map),
            pl.BlockSpec((1, NP), const_map),
        ],
        out_specs=pl.BlockSpec((TB, NP), tile_map),
        compiler_params=pltpu.CompilerParams(
            dimension_semantics=("parallel",)),
    )(x, w1, b1, w2, b2, w3, b3)

    # Batch is exact (grid handles the ragged last block); slice only the padded
    # feature lanes. A fused consumer could instead take the padded block directly.
    return out[:, :target_dim]


def init_params(key, latent_dim, target_dim):
    """Deterministic synthetic init (Kaiming-uniform-ish like PyTorch defaults).

    Returns UNPADDED f32 params with (in, out) layout; pad/cast with prepare_params.
    """
    dims = [(latent_dim, 200), (200, 100), (100, target_dim)]
    params = {}
    for i, (fan_in, fan_out) in enumerate(dims, start=1):
        key, kw, kb = jax.random.split(key, 3)
        bound = 1.0 / jnp.sqrt(fan_in)
        params[f"w{i}"] = jax.random.uniform(
            kw, (fan_in, fan_out), jnp.float32, minval=-bound, maxval=bound)
        # biases kept 2D (1, out) for TPU-friendly broadcasting in-kernel
        params[f"b{i}"] = jax.random.uniform(
            kb, (1, fan_out), jnp.float32, minval=-bound, maxval=bound)
    return params


def _pad2d(a, rows, cols):
    return jnp.pad(a, ((0, rows - a.shape[0]), (0, cols - a.shape[1])))


def prepare_params(params):
    """Zero-pad feature dims to lane multiples (200->256, 100->128, out->128*k),
    cast weights to bf16 (biases stay f32). Zero padding is exact: padded hidden
    columns get bias 0 -> ReLU 0, and feed zero rows of the next weight."""
    latent = params["w1"].shape[0]
    H1 = _round_up(params["w1"].shape[1], 128)
    H2 = _round_up(params["w2"].shape[1], 128)
    NP = _round_up(params["w3"].shape[1], 128)
    return {
        "w1": _pad2d(params["w1"], latent, H1).astype(jnp.bfloat16),
        "b1": _pad2d(params["b1"], 1, H1).astype(jnp.float32),
        "w2": _pad2d(params["w2"], H1, H2).astype(jnp.bfloat16),
        "b2": _pad2d(params["b2"], 1, H2).astype(jnp.float32),
        "w3": _pad2d(params["w3"], H2, NP).astype(jnp.bfloat16),
        "b3": _pad2d(params["b3"], 1, NP).astype(jnp.float32),
    }


def _reference_forward_bf16(x, params):
    """Pure-JAX reference using the same bf16-input / f32-accum recipe as the kernel."""
    xb = x.astype(jnp.bfloat16)
    w1 = params["w1"].astype(jnp.bfloat16)
    w2 = params["w2"].astype(jnp.bfloat16)
    w3 = params["w3"].astype(jnp.bfloat16)
    h1 = jnp.maximum(
        jnp.dot(xb, w1, preferred_element_type=jnp.float32) + params["b1"], 0.0
    ).astype(jnp.bfloat16)
    h2 = jnp.maximum(
        jnp.dot(h1, w2, preferred_element_type=jnp.float32) + params["b2"], 0.0
    ).astype(jnp.bfloat16)
    return jnp.dot(h2, w3, preferred_element_type=jnp.float32) + params["b3"]


if __name__ == "__main__":
    latent_dim, target_dim, batch = 32, 16, 8

    key = jax.random.PRNGKey(0)
    key, kx = jax.random.split(key)
    x = jax.random.normal(kx, (batch, latent_dim), jnp.float32)
    params = init_params(key, latent_dim, target_dim)
    padded_params = prepare_params(params)

    out = bank_generator_forward(x, padded_params, target_dim)
    out = jax.block_until_ready(out)

    ref = _reference_forward_bf16(x, params).astype(jnp.bfloat16)
    assert out.shape == (batch, target_dim)
    assert out.dtype == jnp.bfloat16
    assert jnp.allclose(out.astype(jnp.float32), ref.astype(jnp.float32),
                        atol=1e-2, rtol=1e-2), "mismatch vs reference"

    print("KERNEL_OK")
</pallas_src>

<mosaic_0001>
module attributes {stable_mosaic.version = 11 : i64} {
  func.func @kernel(%arg0: i32, %arg1: memref<8x32xf32, #tpu.memory_space<vmem>>, %arg2: memref<32x256xbf16, #tpu.memory_space<vmem>>, %arg3: memref<1x256xf32, #tpu.memory_space<vmem>>, %arg4: memref<256x128xbf16, #tpu.memory_space<vmem>>, %arg5: memref<1x128xf32, #tpu.memory_space<vmem>>, %arg6: memref<128x128xbf16, #tpu.memory_space<vmem>>, %arg7: memref<1x128xf32, #tpu.memory_space<vmem>>, %arg8: memref<8x128xbf16, #tpu.memory_space<vmem>>) attributes {dimension_semantics = [#tpu.dimension_semantics<parallel>], iteration_bounds = array<i64: 1>, scalar_prefetch = 0 : i64, scratch_operands = 0 : i64, tpu.core_type = #tpu.core_type<tc>, window_params = [{transform_indices = @transform_0, window_bounds = array<i64: 8, 32>}, {pipeline_mode = #tpu.pipeline_mode<synchronous>, transform_indices = @transform_1, window_bounds = array<i64: 32, 256>}, {pipeline_mode = #tpu.pipeline_mode<synchronous>, transform_indices = @transform_2, window_bounds = array<i64: 1, 256>}, {pipeline_mode = #tpu.pipeline_mode<synchronous>, transform_indices = @transform_3, window_bounds = array<i64: 256, 128>}, {pipeline_mode = #tpu.pipeline_mode<synchronous>, transform_indices = @transform_4, window_bounds = array<i64: 1, 128>}, {pipeline_mode = #tpu.pipeline_mode<synchronous>, transform_indices = @transform_5, window_bounds = array<i64: 128, 128>}, {pipeline_mode = #tpu.pipeline_mode<synchronous>, transform_indices = @transform_6, window_bounds = array<i64: 1, 128>}, {transform_indices = @transform_7, window_bounds = array<i64: 8, 128>}]} {
    %c0 = arith.constant 0 : index
    %c0_0 = arith.constant 0 : index
    %0 = vector.load %arg2[%c0, %c0_0] : memref<32x256xbf16, #tpu.memory_space<vmem>>, vector<32x256xbf16>
    %c0_1 = arith.constant 0 : index
    %c0_2 = arith.constant 0 : index
    %1 = vector.load %arg4[%c0_1, %c0_2] : memref<256x128xbf16, #tpu.memory_space<vmem>>, vector<256x128xbf16>
    %c0_3 = arith.constant 0 : index
    %c0_4 = arith.constant 0 : index
    %2 = vector.load %arg6[%c0_3, %c0_4] : memref<128x128xbf16, #tpu.memory_space<vmem>>, vector<128x128xbf16>
    %c0_5 = arith.constant 0 : index
    %c0_6 = arith.constant 0 : index
    %3 = vector.load %arg3[%c0_5, %c0_6] : memref<1x256xf32, #tpu.memory_space<vmem>>, vector<1x256xf32>
    %c0_7 = arith.constant 0 : index
    %c0_8 = arith.constant 0 : index
    %4 = vector.load %arg5[%c0_7, %c0_8] : memref<1x128xf32, #tpu.memory_space<vmem>>, vector<1x128xf32>
    %c0_9 = arith.constant 0 : index
    %c0_10 = arith.constant 0 : index
    %5 = vector.load %arg7[%c0_9, %c0_10] : memref<1x128xf32, #tpu.memory_space<vmem>>, vector<1x128xf32>
    %c0_11 = arith.constant 0 : index
    %c0_12 = arith.constant 0 : index
    %6 = vector.load %arg1[%c0_11, %c0_12] : memref<8x32xf32, #tpu.memory_space<vmem>>, vector<8x32xf32>
    %7 = arith.truncf %6 : vector<8x32xf32> to vector<8x32xbf16>
    %cst = arith.constant dense<0.000000e+00> : vector<8x256xf32>
    %8 = tpu.matmul %7, %0, %cst {dimension_numbers = #tpu.dot_dimension_numbers<[1], [0], [0], [1], [0, 0, 1, 1], [], []>} : vector<8x32xbf16>, vector<32x256xbf16>, vector<8x256xf32> -> vector<8x256xf32>
    %9 = vector.broadcast %3 : vector<1x256xf32> to vector<8x256xf32>
    %10 = arith.addf %8, %9 : vector<8x256xf32>
    %cst_13 = arith.constant 0.000000e+00 : f32
    %11 = vector.broadcast %cst_13 : f32 to vector<8x256xf32>
    %12 = arith.maximumf %10, %11 : vector<8x256xf32>
    %13 = arith.truncf %12 : vector<8x256xf32> to vector<8x256xbf16>
    %cst_14 = arith.constant dense<0.000000e+00> : vector<8x128xf32>
    %14 = tpu.matmul %13, %1, %cst_14 {dimension_numbers = #tpu.dot_dimension_numbers<[1], [0], [0], [1], [0, 0, 1, 1], [], []>} : vector<8x256xbf16>, vector<256x128xbf16>, vector<8x128xf32> -> vector<8x128xf32>
    %15 = vector.broadcast %4 : vector<1x128xf32> to vector<8x128xf32>
    %16 = arith.addf %14, %15 : vector<8x128xf32>
    %cst_15 = arith.constant 0.000000e+00 : f32
    %17 = vector.broadcast %cst_15 : f32 to vector<8x128xf32>
    %18 = arith.maximumf %16, %17 : vector<8x128xf32>
    %19 = arith.truncf %18 : vector<8x128xf32> to vector<8x128xbf16>
    %cst_16 = arith.constant dense<0.000000e+00> : vector<8x128xf32>
    %20 = tpu.matmul %19, %2, %cst_16 {dimension_numbers = #tpu.dot_dimension_numbers<[1], [0], [0], [1], [0, 0, 1, 1], [], []>} : vector<8x128xbf16>, vector<128x128xbf16>, vector<8x128xf32> -> vector<8x128xf32>
    %21 = vector.broadcast %5 : vector<1x128xf32> to vector<8x128xf32>
    %22 = arith.addf %20, %21 : vector<8x128xf32>
    %23 = arith.truncf %22 : vector<8x128xf32> to vector<8x128xbf16>
    %c0_17 = arith.constant 0 : index
    %c0_18 = arith.constant 0 : index
    %24 = vector.load %arg8[%c0_17, %c0_18] : memref<8x128xbf16, #tpu.memory_space<vmem>>, vector<8x128xbf16>
    tpu.vector_store %arg8[%c0_17, %c0_18], %23 {strides = array<i32>} : memref<8x128xbf16, #tpu.memory_space<vmem>>, vector<8x128xbf16>,
    return
  }
  func.func @transform_0(%arg0: i32) -> (i32, i32) {
    %c0_i32 = arith.constant 0 : i32
    %c0_i32_0 = arith.constant 0 : i32
    return %arg0, %c0_i32 : i32, i32
  }
  func.func @transform_1(%arg0: i32) -> (i32, i32) {
    %c0_i32 = arith.constant 0 : i32
    %c0_i32_0 = arith.constant 0 : i32
    %c0_i32_1 = arith.constant 0 : i32
    return %c0_i32, %c0_i32_0 : i32, i32
  }
  func.func @transform_2(%arg0: i32) -> (i32, i32) {
    %c0_i32 = arith.constant 0 : i32
    %c0_i32_0 = arith.constant 0 : i32
    %c0_i32_1 = arith.constant 0 : i32
    return %c0_i32, %c0_i32_0 : i32, i32
  }
  func.func @transform_3(%arg0: i32) -> (i32, i32) {
    %c0_i32 = arith.constant 0 : i32
    %c0_i32_0 = arith.constant 0 : i32
    %c0_i32_1 = arith.constant 0 : i32
    return %c0_i32, %c0_i32_0 : i32, i32
  }
  func.func @transform_4(%arg0: i32) -> (i32, i32) {
    %c0_i32 = arith.constant 0 : i32
    %c0_i32_0 = arith.constant 0 : i32
    %c0_i32_1 = arith.constant 0 : i32
    return %c0_i32, %c0_i32_0 : i32, i32
  }
  func.func @transform_5(%arg0: i32) -> (i32, i32) {
    %c0_i32 = arith.constant 0 : i32
    %c0_i32_0 = arith.constant 0 : i32
    %c0_i32_1 = arith.constant 0 : i32
    return %c0_i32, %c0_i32_0 : i32, i32
  }
  func.func @transform_6(%arg0: i32) -> (i32, i32) {
    %c0_i32 = arith.constant 0 : i32
    %c0_i32_0 = arith.constant 0 : i32
    %c0_i32_1 = arith.constant 0 : i32
    return %c0_i32, %c0_i32_0 : i32, i32
  }
  func.func @transform_7(%arg0: i32) -> (i32, i32) {
    %c0_i32 = arith.constant 0 : i32
    %c0_i32_0 = arith.constant 0 : i32
    return %arg0, %c0_i32 : i32, i32
  }
}

</mosaic_0001>

<bundles_post_ra>
// kernel: tpu_custom_call.1
= control target key start
LH: loop header
LB: loop body
LE: loop exit
PB: predicated region body
PF: predicated region fallthrough
CT: control target
= control target key end

     0   :  { %12 = vsyncpa [#allocation3], 0  ;;  %s838_s0 = inlined_call_operand.hbm [shape: f32[8,32], index: 0, kind: input, shape index: {}]   ;;  %s839_s1 = inlined_call_operand.hbm [shape: bf16[32,256], index: 1, kind: input, shape index: {}]   ;;  %s840_s2 = inlined_call_operand.vmem [shape: f32[1,256], index: 2, kind: input, shape index: {}]   ;;  %s841_s3 = inlined_call_operand.hbm [shape: bf16[256,128], index: 3, kind: input, shape index: {}]   ;;  %s842_s4 = inlined_call_operand.vmem [shape: f32[1,128], index: 4, kind: input, shape index: {}]   ;;  %s843_s5 = inlined_call_operand.hbm [shape: bf16[128,128], index: 5, kind: input, shape index: {}]   ;;  %s844_s6 = inlined_call_operand.vmem [shape: f32[1,128], index: 6, kind: input, shape index: {}]   ;;  %s845_s7 = inlined_call_operand.hbm [shape: bf16[8,128], index: 7, kind: output, shape index: {}]  }
   0x1   :  { %13 = vsyncpa [#allocation6], 0 }
   0x2   :  { %14 = vsyncpa [#allocation9], 0 }
   0x3   :  { %15 = vsyncpa [#allocation4], 0  ;;  %s717_s24 = smov [#allocation5]   ;;  %s599_s28 = scalar_lea.hbm %s839_s1, 512 }
   0x4   :  { %s31_s25 = sshll.u32 %s717_s24, 4  ;;  %p600_p0 = scmp.ne.s32.totalorder %s839_s1, %s599_s28  ;;  %s32_s25 = int_to_ptr.vmem [resolvable:$true] %s31_s25 }
   0x5   :  { %p603_p1 = scmp.lt.u32.totalorder %s599_s28, %s839_s1 }
   0x7   :  { %p605_p2 = pnand %p603_p1, %p600_p0 }
   0x9   :  { %608 = shalt.err (!%p605_p2)
}
   0xa   :  { %s609_s10 = scalar_lea.vmem %s32_s25, 512  ;;  %p614_p4 = scmp.lt.s32.totalorder %s32_s25, %s32_s25 }
   0xb   :  { %p610_p3 = scmp.ne.s32.totalorder %s32_s25, %s609_s10  ;;  %p615_p5 = scmp.lt.s32.totalorder %s609_s10, %s609_s10 }
   0xd   :  { %p616_p6 = por %p615_p5, %p614_p4 }
   0xf   :  { %p617_p7 = pnand %p616_p6, %p610_p3 }
  0x11   :  { %620 = shalt.err (!%p617_p7)
}
  0x12   :  { %s718_s11 = smov 128   ;;  %s719_s12 = smov 8  }
  0x13   :  { %37 = dma.hbm_to_vmem [thread:$0]  %s839_s1, 512, %s32_s25, [#allocation6], %s718_s11, %s718_s11, %s719_s12  }
  0x14   :  { %s720_s15 = smov [#allocation2]   ;;  %s721_s17 = smov [#allocation7]  }
  0x15   :  { %s22_s16 = sshll.u32 %s720_s15, 4  ;;  %s45_s18 = sshll.u32 %s721_s17, 4  ;;  %s23_s16 = int_to_ptr.vmem [resolvable:$true] %s22_s16  ;;  %s46_s18 = int_to_ptr.vmem [resolvable:$true] %s45_s18 }
  0x16   :  { %s621_s21 = scalar_lea.hbm %s838_s0, 128 }
  0x17   :  { %p622_p8 = scmp.ne.s32.totalorder %s838_s0, %s621_s21  ;;  %p625_p9 = scmp.lt.u32.totalorder %s621_s21, %s838_s0 }
  0x19   :  { %p627_p10 = pnand %p625_p9, %p622_p8 }
  0x1b   :  { %630 = shalt.err (!%p627_p10)
}
  0x1c   :  { %s631_s1 = scalar_lea.vmem %s23_s16, 128  ;;  %p636_p12 = scmp.lt.s32.totalorder %s23_s16, %s23_s16 }
  0x1d   :  { %p632_p11 = scmp.ne.s32.totalorder %s23_s16, %s631_s1  ;;  %p637_p13 = scmp.lt.s32.totalorder %s631_s1, %s631_s1 }
  0x1f   :  { %p638_p0 = por %p637_p13, %p636_p12 }
  0x21   :  { %p639_p1 = pnand %p638_p0, %p632_p11 }
  0x23   :  { %642 = shalt.err (!%p639_p1)
}
  0x24   :  { %25 = dma.hbm_to_vmem [thread:$0]  %s838_s0, 128, %s23_s16, [#allocation3]  }
  0x25   :  { %s643_s30 = scalar_lea.hbm %s841_s3, 2048 }
  0x26   :  { %p644_p2 = scmp.ne.s32.totalorder %s841_s3, %s643_s30  ;;  %p647_p3 = scmp.lt.u32.totalorder %s643_s30, %s841_s3 }
  0x28   :  { %p649_p4 = pnand %p647_p3, %p644_p2 }
  0x2a   :  { %652 = shalt.err (!%p649_p4)
}
  0x2b   :  { %s653_s12 = scalar_lea.vmem %s46_s18, 2048  ;;  %p658_p6 = scmp.lt.s32.totalorder %s46_s18, %s46_s18 }
  0x2c   :  { %p654_p5 = scmp.ne.s32.totalorder %s46_s18, %s653_s12  ;;  %p659_p7 = scmp.lt.s32.totalorder %s653_s12, %s653_s12 }
  0x2e   :  { %p660_p8 = por %p659_p7, %p658_p6 }
  0x30   :  { %p661_p9 = pnand %p660_p8, %p654_p5 }
  0x32   :  { %664 = shalt.err (!%p661_p9)
}
  0x33   :  { %s722_s0 = smov 64   ;;  %s723_s13 = smov 4  }
  0x34   :  { %51 = dma.hbm_to_vmem [thread:$0]  %s841_s3, 2048, %s46_s18, [#allocation6], %s722_s0, %s722_s0, %s723_s13  }
  0x35   :  { %s724_s16 = smov [#allocation8]   ;;  %s665_s21 = scalar_lea.hbm %s843_s5, 1024 }
  0x36   :  { %s59_s17 = sshll.u32 %s724_s16, 4  ;;  %p666_p10 = scmp.ne.s32.totalorder %s843_s5, %s665_s21  ;;  %s60_s17 = int_to_ptr.vmem [resolvable:$true] %s59_s17 }
  0x37   :  { %p669_p11 = scmp.lt.u32.totalorder %s665_s21, %s843_s5 }
  0x39   :  { %p671_p12 = pnand %p669_p11, %p666_p10 }
  0x3b   :  { %674 = shalt.err (!%p671_p12)
}
  0x3c   :  { %s675_s1 = scalar_lea.vmem %s60_s17, 1024  ;;  %p680_p0 = scmp.lt.s32.totalorder %s60_s17, %s60_s17 }
  0x3d   :  { %p676_p13 = scmp.ne.s32.totalorder %s60_s17, %s675_s1  ;;  %p681_p1 = scmp.lt.s32.totalorder %s675_s1, %s675_s1 }
  0x3f   :  { %p682_p2 = por %p681_p1, %p680_p0 }
  0x41   :  { %p683_p3 = pnand %p682_p2, %p676_p13 }
  0x43   :  { %686 = shalt.err (!%p683_p3)
}
  0x44   :  { %65 = dma.hbm_to_vmem [thread:$0]  %s843_s5, 1024, %s60_s17, [#allocation9], %s722_s0, %s722_s0, %s723_s13  }
  0x45   :  { %709 = dma.done.wait [#allocation3], 128  }
  0x46   :  { %710 = vsyncadd [#allocation3], 4294967168 }
  0x47   :  { %711 = dma.done.wait [#allocation6], 2560  }
  0x48   :  { %712 = vsyncadd [#allocation6], 4294964736 }
  0x49   :  { %713 = dma.done.wait [#allocation9], 1024  }
  0x4a   :  { %714 = vsyncadd [#allocation9], 4294966272  ;;  %v725_v0 = vmov 0   ;;  %v569_v1 = vld [vmem:[#allocation5 + $0x4] ss:$8 sps:$4 sm:$0xff]   ;;  %v136_v5 = vld [vmem:[#allocation2] sm:$0xff]  ;;  %v139_v30 = vlaneseq }
  0x4b   :  { %205 = vmatprep.mubr.bf16.mxu0 %v725_v0  ;;  %v571_v2 = vld [vmem:[#allocation5] ss:$8 sps:$4 sm:$0xff]   ;;  %173 = vmatprep.subr.bf16.mxu0 %v569_v1  ;;  %v572_v3 = vld [vmem:[#allocation5 + $0x14] ss:$8 sps:$4 sm:$0xff]   ;;  %v574_v4 = vld [vmem:[#allocation5 + $0x10] ss:$8 sps:$4 sm:$0xff]   ;;  %v137_v9 = vpack.c.bf16 %v136_v5, %v136_v5 }
  0x4c   :  { %174 = vmatpush1.bf16.msra.mxu0 %v571_v2  ;;  %v575_v6 = vld [vmem:[#allocation7 + $0x40] sm:$0xff]   ;;  %v577_v8 = vld [vmem:[#allocation7 + $0x48] sm:$0xff]   ;;  %vm169_vm0 = vcmask 261120   ;;  %v579_v11 = vld [vmem:[#allocation7 + $0x50] sm:$0xff]   ;;  %v726_v24 = vmov 0.0   ;;  %v140_v31 = vshrl.u32 %v139_v30, 7 }
  0x4d   :  { %175 = vmatprep.subr.bf16.mxu0 %v572_v3  ;;  %v576_v7 = vld [vmem:[#allocation7] sm:$0xff]   ;;  %506 = vmatprep.subr.bf16.mxu1 %v575_v6  ;;  %v578_v10 = vld [vmem:[#allocation7 + $0x8] sm:$0xff]   ;;  %v580_v12 = vld [vmem:[#allocation7 + $0x10] sm:$0xff]   ;;  %vm727_vm1 = vmmov 0   ;;  %s728_s30 = smov [#allocation10]  }
  0x4e   :  { %507 = vmatpush3.bf16.msra.mxu1 %v576_v7  ;;  %v581_v13 = vld [vmem:[#allocation7 + $0x58] sm:$0xff]   ;;  %v583_v15 = vld [vmem:[#allocation7 + $0x60] sm:$0xff]   ;;  %v585_v17 = vld [vmem:[#allocation7 + $0x68] sm:$0xff]   ;;  %v141_v32 = vsub.s32 0, %v140_v31  ;;  %v145_v34 = vsub.s32 1, %v140_v31  ;;  %s464_s8 = sshll.u32 %s728_s30, 4  ;;  %s465_s8 = int_to_ptr.vmem [resolvable:$true] %s464_s8 }
  0x4f   :  { %508 = vmatprep.subr.bf16.mxu1 %v577_v8  ;;  %v582_v14 = vld [vmem:[#allocation7 + $0x18] sm:$0xff]   ;;  %v584_v16 = vld [vmem:[#allocation7 + $0x20] sm:$0xff]   ;;  %v586_v18 = vld [vmem:[#allocation7 + $0x28] sm:$0xff]   ;;  %p692_p5 = scmp.lt.s32.totalorder %s465_s8, %s465_s8 }
  0x50   :  { %176 = vmatpush1.bf16.msra.mxu0 %v574_v4  ;;  %v587_v19 = vld [vmem:[#allocation7 + $0x70] sm:$0xff]   ;;  %v589_v21 = vld [vmem:[#allocation7 + $0x78] sm:$0xff]   ;;  %v591_v23 = vld [vmem:[#allocation8] sm:$0xff]  }
  0x51   :  { %v588_v20 = vld [vmem:[#allocation7 + $0x30] sm:$0xff]   ;;  %v590_v22 = vld [vmem:[#allocation7 + $0x38] sm:$0xff]   ;;  %537 = vmatprep.subr.bf16.mxu0 %v726_v24  ;;  %v592_v25 = vld [vmem:[#allocation8 + $0x8] sm:$0xff]  }
  0x52   :  { %509 = vmatpush3.bf16.msra.mxu1 %v578_v10  ;;  %v593_v26 = vld [vmem:[#allocation8 + $0x10] sm:$0xff]   ;;  %v594_v27 = vld [vmem:[#allocation8 + $0x18] sm:$0xff]   ;;  %v595_v28 = vld [vmem:[#allocation8 + $0x20] sm:$0xff]  }
  0x53   :  { %479 = vmatmul.mubr.msk.bf16.vlgmr.msra.gmra.mrb[0].mxu0 %vm169_vm0, %v137_v9  ;;  %510 = vmatprep.subr.bf16.mxu1 %v579_v11  ;;  %v596_v29 = vld [vmem:[#allocation8 + $0x28] sm:$0xff]   ;;  %v133_v33 = vld [vmem:[%s840_s2] sm:$0x3]  ;;  %v597_v47 = vld [vmem:[#allocation8 + $0x30] sm:$0xff]  }
  0x54   :  { %538 = vmatpush3.bf16.msra.mxu0 %v591_v23  ;;  %v142_v35 = vrot.slane %v133_v33, %v141_v32  ;;  %v146_v36 = vrot.slane %v133_v33, %v145_v34  ;;  %v598_v48 = vld [vmem:[#allocation8 + $0x38] sm:$0xff]   ;;  %553 = vmatprep.mubr.msk.bf16.mxu0 %vm727_vm1, %v726_v24 }
  0x55   :  { %539 = vmatprep.subr.bf16.mxu0 %v726_v24  ;;  %v480_v50 = vld [vmem:[%s842_s4] ss:$0 sm:$0xff]  ;;  %s687_s4 = scalar_lea.vmem %s465_s8, 64 }
  0x56   :  { %511 = vmatpush3.bf16.msra.mxu1 %v580_v12  ;;  %v497_v58 = vld [vmem:[%s844_s6] ss:$0 sm:$0xff]  ;;  %p688_p4 = scmp.ne.s32.totalorder %s465_s8, %s687_s4  ;;  %p693_p6 = scmp.lt.s32.totalorder %s687_s4, %s687_s4 }
  0x57   :  { %512 = vmatprep.subr.bf16.mxu1 %v581_v13 }
  0x58   :  { %540 = vmatpush3.bf16.msra.mxu0 %v592_v25  ;;  %p694_p7 = por %p693_p6, %p692_p5 }
  0x59   :  { %541 = vmatprep.subr.bf16.mxu0 %v726_v24 }
  0x5a   :  { %513 = vmatpush3.bf16.msra.mxu1 %v582_v14  ;;  %p695_p8 = pnand %p694_p7, %p688_p4 }
  0x5b   :  { %514 = vmatprep.subr.bf16.mxu1 %v583_v15 }
  0x5c   :  { %542 = vmatpush3.bf16.msra.mxu0 %v593_v26 }
  0x5d   :  { %543 = vmatprep.subr.bf16.mxu0 %v726_v24 }
  0x5e   :  { %515 = vmatpush3.bf16.msra.mxu1 %v584_v16 }
  0x5f   :  { %516 = vmatprep.subr.bf16.mxu1 %v585_v17 }
  0x60   :  { %544 = vmatpush3.bf16.msra.mxu0 %v594_v27 }
  0x61   :  { %545 = vmatprep.subr.bf16.mxu0 %v726_v24 }
  0x62   :  { %517 = vmatpush3.bf16.msra.mxu1 %v586_v18 }
  0x63   :  { %518 = vmatprep.subr.bf16.mxu1 %v587_v19 }
  0x64   :  { %546 = vmatpush3.bf16.msra.mxu0 %v595_v28 }
  0x65   :  { %547 = vmatprep.subr.bf16.mxu0 %v726_v24 }
  0x66   :  { %519 = vmatpush3.bf16.msra.mxu1 %v588_v20 }
  0x67   :  { %520 = vmatprep.subr.bf16.mxu1 %v589_v21 }
  0x68   :  { %548 = vmatpush3.bf16.msra.mxu0 %v596_v29 }
  0x69   :  { %549 = vmatprep.subr.bf16.mxu0 %v726_v24 }
  0x6a   :  { %521 = vmatpush3.bf16.msra.mxu1 %v590_v22 }
  0x6c   :  { %550 = vmatpush3.bf16.msra.mxu0 %v597_v47 }
  0x6d   :  { %551 = vmatprep.subr.bf16.mxu0 %v726_v24 }
  0x70   :  { %552 = vmatpush3.bf16.msra.mxu0 %v598_v48 }
 0x126   :  { %v207_v37 = vpop.f32.mrb[0].mxu0 }
 0x127   :  { %v208_v38 = vadd.f32 %v207_v37, %v142_v35  ;;  %v209_v39 = vpop.f32.mrb[1].mxu0 }
 0x128   :  { %v210_v40 = vadd.f32 %v209_v39, %v146_v36  ;;  %v211_v41 = vpop.f32.mrb[2].mxu0 }
 0x129   :  { %v214_v42 = vmax.f32 %v208_v38, 0.0  ;;  %v212_v43 = vpop.f32.mrb[3].mxu0 }
 0x12a   :  { %v215_v44 = vmax.f32 %v210_v40, 0.0 }
 0x12b   :  { %v216_v46 = vpack.c.bf16 %v214_v42, %v214_v42 }
 0x12c   :  { %v217_v45 = vpack.c.bf16 %v215_v44, %v215_v44 }
 0x12e   :  { %352 = vmatprep.mubr.bf16.mxu1 %v217_v45 }
 0x12f   :  { %353 = vmatmul.mubr.bf16.vlgmr.msra.gmra.mrb[0].mxu1 %v216_v46 }
 0x202   :  { %v522_v49 = vpop.f32.mrb[0].mxu1 }
 0x203   :  { %v523_v51 = vpop.f32.mrb[1].mxu1 }
 0x204   :  { %v524_v52 = vadd.f32 %v523_v51, %v522_v49  ;;  %v525_v53 = vpop.f32.mrb[2].mxu1 }
 0x205   :  { %v526_v54 = vpop.f32.mrb[3].mxu1 }
 0x206   :  { %v355_v55 = vadd.f32 %v524_v52, %v480_v50 }
 0x208   :  { %v360_v56 = vmax.f32 %v355_v55, 0.0 }
 0x20a   :  { %v361_v57 = vpack.c.bf16 %v360_v56, %v360_v56 }
 0x20c   :  { %554 = vmatmul.mubr.bf16.vlgmr.msra.gmra.mrb[4].mxu0 %v361_v57 }
 0x2df   :  { %v450_v59 = vpop.f32.mrb[4].mxu0 }
 0x2e0   :  { %v451_v60 = vadd.f32 %v497_v58, %v450_v59  ;;  %v555_v61 = vpop.f32.mrb[5].mxu0 }
 0x2e1   :  { %v453_v62 = vpop.f32.mrb[6].mxu0 }
 0x2e2   :  { %v456_v63 = vpack.c.bf16 %v451_v60, %v451_v60  ;;  %v556_v0 = vpop.f32.mrb[7].mxu0 }
 0x2e4   :  { %457 = vst [vmem:[#allocation10] sm:$0xf] %v456_v63 }
 0x2e5   :  { %698 = shalt.err (!%p695_p8)
}
 0x2e6   :  { %s699_s6 = scalar_lea.hbm %s845_s7, 64 }
 0x2e7   :  { %p700_p9 = scmp.ne.s32.totalorder %s845_s7, %s699_s6  ;;  %p703_p10 = scmp.lt.u32.totalorder %s699_s6, %s845_s7 }
 0x2e9   :  { %p705_p11 = pnand %p703_p10, %p700_p9 }
 0x2eb   :  { %708 = shalt.err (!%p705_p11)
}
 0x2ec   :  { %467 = dma.vmem_to_hbm [thread:$0]  %s465_s8, 64, %s845_s7, [#allocation4]  }
 0x2ed   :  { %715 = dma.done.wait [#allocation4], 64  }
 0x2ee   :  { %716 = vsyncadd [#allocation4], 4294967232 }
 0x2ef   :  { %471 = vsyncpa [#allocation3], 1 }
 0x2f0   :  { %472 = vsyncpa [#allocation6], 1 }
 0x2f1   :  { %473 = vsyncpa [#allocation9], 1 }
 0x2f2   :  { %474 = vsyncpa [#allocation4], 1 }

</bundles_post_ra>
